<compile_context>
chip_gen: v7x
topology: tpu7x:2x2x1
jax: 0.10.0
libtpu: 0.0.40
codegen_flags: <defaults>
</compile_context>

<pallas_src>
import math
from typing import Dict, List, Optional, Sequence, Tuple

import jax
import jax.numpy as jnp
from jax.experimental import pallas as pl
from jax.experimental.pallas import tpu as pltpu


# ----------------------------------------------------------------------------
# Pallas kernel: fused batch-replication of lane-dense flattened parameters.
# refs = (param_0, ..., param_{N-1}, out_0, ..., out_{N-1})
#   param_i block: (1,  L_i)  -- L_i = R_i * C_i, multiple of 128 (lane-dense)
#   out_i   block: (bb, L_i)  -- batch-blocked, full-extent lane dim
# ----------------------------------------------------------------------------
def _make_replicate_kernel(num_params: int):
    def kernel(*refs):
        param_refs = refs[:num_params]
        out_refs = refs[num_params:2 * num_params]
        for p_ref, o_ref in zip(param_refs, out_refs):
            # (1, L) -> (bb, L): cheap sublane broadcast (VPU fill); the kernel
            # is HBM-write-bound so this hides under the output writeback DMA.
            o_ref[...] = jnp.broadcast_to(p_ref[...], o_ref.shape).astype(o_ref.dtype)
    return kernel


# ~8 MiB per grid step: amortizes the ~0.35 us per-step overhead even at
# v7x's ~3.2 TB/s HBM write bandwidth, while 2x double-buffered outputs
# (<= 16 MiB) stay well inside the 32 MiB scoped VMEM limit on all chips.
_TARGET_TILE_BYTES = 8 << 20


def _choose_batch_block(batch_size: int, bytes_per_batch_row: int,
                        target_bytes: int = _TARGET_TILE_BYTES) -> int:
    """Pick a batch block: big (amortize step overhead), (8,128)-legal, and
    preferably an exact divisor of batch_size (no ragged final block)."""
    if batch_size * bytes_per_batch_row <= target_bytes:
        return batch_size                       # single full-extent block
    max_rows = max(8, target_bytes // max(bytes_per_batch_row, 1))
    # Prefer the largest multiple-of-8 divisor of batch_size that fits the
    # target: every grid step then does a full, unmasked writeback.
    best = 0
    d = 8
    limit = min(batch_size, max_rows)
    while d <= limit:
        if batch_size % d == 0:
            best = d
        d += 8
    if best:
        return best
    # Fallback: ragged final block (Pallas masks the out-of-range rows of the
    # last block on writeback).
    bb = max(8, (max_rows // 8) * 8)
    return min(bb, batch_size)


# Cache of the dimension-semantics variant this chip accepted, so later calls
# don't retry a rejected CORE_PARALLEL compile.
_PREFERRED_SEMANTICS: Optional[tuple] = None


def _dim_semantics_candidates() -> List[tuple]:
    cands: List[tuple] = []
    core_parallel = getattr(pltpu, "CORE_PARALLEL", None)
    if core_parallel is not None:
        # Shard batch blocks across TensorCores (2 TCs on v7x -> ~2x write BW).
        cands.append((core_parallel,))
    cands.append(("parallel",))                 # known-good fallback
    return cands


def _pallas_replicate(flats: Sequence[jax.Array], batch_size: int,
                      out_dtypes: Sequence) -> List[jax.Array]:
    """One fused pallas_call: replicate each (1, L_i) row into (batch, L_i)."""
    global _PREFERRED_SEMANTICS

    num_params = len(flats)
    in_itemsizes = [jnp.dtype(f.dtype).itemsize for f in flats]
    out_itemsizes = [jnp.dtype(d).itemsize for d in out_dtypes]
    bytes_per_row = sum(f.shape[1] * sz for f, sz in zip(flats, out_itemsizes))

    bb = _choose_batch_block(batch_size, bytes_per_row)
    grid = (pl.cdiv(batch_size, bb),)

    in_specs = [pl.BlockSpec((1, f.shape[1]), lambda i: (0, 0)) for f in flats]
    out_specs = [pl.BlockSpec((bb, f.shape[1]), lambda i: (i, 0)) for f in flats]
    out_shape = tuple(jax.ShapeDtypeStruct((batch_size, f.shape[1]), d)
                      for f, d in zip(flats, out_dtypes))

    bytes_accessed = (sum(f.shape[1] * sz for f, sz in zip(flats, in_itemsizes))
                      + batch_size * bytes_per_row)

    candidates = _dim_semantics_candidates()
    if _PREFERRED_SEMANTICS is not None and _PREFERRED_SEMANTICS in candidates:
        candidates.remove(_PREFERRED_SEMANTICS)
        candidates.insert(0, _PREFERRED_SEMANTICS)

    last_err: Optional[Exception] = None
    for sem in candidates:
        try:
            call = pl.pallas_call(
                _make_replicate_kernel(num_params),
                out_shape=out_shape,
                grid_spec=pltpu.PrefetchScalarGridSpec(
                    num_scalar_prefetch=0,
                    grid=grid,
                    in_specs=in_specs,
                    out_specs=out_specs,
                ),
                compiler_params=pltpu.CompilerParams(
                    dimension_semantics=sem,
                    vmem_limit_bytes=32 << 20,
                ),
                cost_estimate=pl.CostEstimate(
                    flops=0, transcendentals=0, bytes_accessed=bytes_accessed),
            )
            outs = call(*flats)
            if not isinstance(outs, (list, tuple)):
                outs = (outs,)
            _PREFERRED_SEMANTICS = sem
            return list(outs)
        except Exception as err:   # e.g. CORE_PARALLEL unsupported on this chip
            last_err = err
    raise last_err


def broadcast_params_to_batch(params: Sequence[jax.Array], batch_size: int,
                              out_dtype=None) -> List[jax.Array]:
    """Replicate each 2-D [R_i, C_i] parameter across a flattened batch.

    Returns a list of [batch_size, R_i * C_i] arrays (row-major compatible
    with reshaping to [batch_size, R_i, C_i]).  Parameters whose flattened
    length is a multiple of 128 lanes are materialized by one fused Pallas
    call (wide, unmasked stores); sub-128-lane parameters use a plain XLA
    broadcast so the kernel never pays masked partial stores or extra per-step
    DMA descriptors for tiny tensors.
    """
    flats = [p.reshape(1, p.shape[0] * p.shape[1]) for p in params]
    dtypes = [jnp.dtype(out_dtype) if out_dtype is not None else f.dtype
              for f in flats]

    pallas_ids = [i for i, f in enumerate(flats) if f.shape[1] % 128 == 0]
    xla_ids = [i for i in range(len(flats)) if f"{i}" not in {f"{j}" for j in pallas_ids}]

    results: List[Optional[jax.Array]] = [None] * len(flats)
    if pallas_ids:
        pallas_outs = _pallas_replicate([flats[i] for i in pallas_ids], batch_size,
                                        [dtypes[i] for i in pallas_ids])
        for i, o in zip(pallas_ids, pallas_outs):
            results[i] = o
    for i in xla_ids:
        results[i] = jnp.broadcast_to(flats[i].astype(dtypes[i]),
                                      (batch_size, flats[i].shape[1]))
    return results  # type: ignore[return-value]


# ----------------------------------------------------------------------------
# Parameter initialization (mimics nn.init.kaiming_uniform, a=0)
# ----------------------------------------------------------------------------
def kaiming_uniform(key, shape: Tuple[int, ...], dtype=jnp.float32) -> jax.Array:
    # For a 2-D [rows, cols] tensor: fan_in = cols; gain = sqrt(2);
    # bound = gain * sqrt(3 / fan_in) = sqrt(6 / fan_in).
    fan_in = shape[-1]
    bound = math.sqrt(6.0 / fan_in)
    return jax.random.uniform(key, shape, dtype=dtype, minval=-bound, maxval=bound)


# Constraint-name helpers (mirroring the PyTorch module's bookkeeping).
_TOKEN_DIM = "Tokens"
_ENSEMBLE_DIM = "Ensemble_Dim"
_EMBEDDING_DIM = "Embedding_Width"


def make_ensemble_constraint_list(num_ensemble_dims: int) -> List[str]:
    return [f"{_ENSEMBLE_DIM}_{i}" for i in range(num_ensemble_dims)]


def make_embedding_constraint(num_ensemble_dims: int) -> List[str]:
    return make_ensemble_constraint_list(num_ensemble_dims) + [_TOKEN_DIM, _EMBEDDING_DIM]


def make_weights_constraint(num_ensemble_dims: int, head_name: str) -> List[str]:
    return make_ensemble_constraint_list(num_ensemble_dims) + [head_name, _TOKEN_DIM]


# ----------------------------------------------------------------------------
# ParametersBasedSetup (JAX / Pallas version)
# ----------------------------------------------------------------------------
class ParametersBasedSetup:
    """Builds the NTM working-memory bundle from learned default parameters.

    ensemble_shape is None (module default): parameters have no leading
    ensemble dims.  forward(batch_shape) broadcasts each parameter into the
    requested batch shape.  By default it returns broadcast *views* (exactly
    the torch.broadcast_to semantics of the reference module — zero HBM write
    traffic); pass materialize=True to get dense copies produced by a single
    fused Pallas replication kernel.
    """

    def __init__(self, d_model: int, num_memory_tokens: int,
                 head_info: Dict[str, int], *, key, dtype=jnp.float32):
        self.d_model = d_model
        self.num_memory_tokens = num_memory_tokens
        self.head_info = dict(head_info)
        num_ensemble_dims = 0  # ensemble_shape=None

        k_mem, *k_heads = jax.random.split(key, 1 + len(head_info))

        # Memory parameter: [num_memory_tokens, d_model]
        self.mem_parameter = kaiming_uniform(
            k_mem, (num_memory_tokens, d_model), dtype)
        self.mem_constraints = make_embedding_constraint(num_ensemble_dims)

        # Per-head weight parameters: [head_len, num_memory_tokens]
        self.weight_parameters: Dict[str, jax.Array] = {}
        self.weight_constraints: Dict[str, List[str]] = {}
        for kh, (head_name, head_len) in zip(k_heads, head_info.items()):
            self.weight_parameters[head_name] = kaiming_uniform(
                kh, (head_len, num_memory_tokens), dtype)
            self.weight_constraints[head_name] = make_weights_constraint(
                num_ensemble_dims, head_name)

    def forward(self, batch_shape, *, materialize: bool = False,
                out_dtype=None) -> Dict[str, object]:
        if isinstance(batch_shape, int):
            batch_shape = (batch_shape,)
        batch_shape = tuple(int(b) for b in batch_shape)
        num_batch_dim = len(batch_shape)

        names = ["Memory"] + list(self.weight_parameters.keys())
        params = [self.mem_parameter] + [self.weight_parameters[n] for n in names[1:]]

        bundle_tensors: Dict[str, jax.Array] = {}
        if not materialize:
            # Default: broadcast views, matching torch.broadcast_to.  Inside a
            # jitted consumer XLA keeps these as broadcasts — no replication
            # traffic is ever paid.
            for name, param in zip(names, params):
                p = param if out_dtype is None else param.astype(out_dtype)
                bundle_tensors[name] = jnp.broadcast_to(p, batch_shape + param.shape)
        else:
            B = 1
            for b in batch_shape:
                B *= b
            # Dense fallback: one fused Pallas call for the lane-dense params,
            # plain XLA broadcast for the tiny sub-128-lane ones.
            flat_outs = broadcast_params_to_batch(params, B, out_dtype=out_dtype)
            for name, param, flat in zip(names, params, flat_outs):
                # (B, R*C) -> (*batch, R, C): row-major-compatible (free) reshape.
                bundle_tensors[name] = flat.reshape(batch_shape + param.shape)

        bundle_constraints: Dict[str, List[str]] = {"Memory": self.mem_constraints}
        for name in self.weight_parameters:
            bundle_constraints[name] = self.weight_constraints[name]

        # TODO(synk): Core.BundleTensor has no Pallas/JAX equivalent; return a
        # plain dict carrying the same (num_batch_dim, tensors, constraints).
        return {
            "num_batch_dim": num_batch_dim,
            "tensors": bundle_tensors,
            "constraints": bundle_constraints,
        }

    __call__ = forward


# ----------------------------------------------------------------------------
# Demo / smoke test
# ----------------------------------------------------------------------------
if __name__ == "__main__":
    key = jax.random.PRNGKey(0)

    d_model = 32
    num_memory_tokens = 16
    # Reader head flattens to 8*16 = 128 lanes (goes through the Pallas path);
    # writer head flattens to 4*16 = 64 lanes (plain-XLA path by design).
    head_info = {"Reader_Weights_Logits_0": 8, "Writer_Weights_Logits_0": 4}
    batch_shape = (2, 3)

    setup = ParametersBasedSetup(d_model, num_memory_tokens, head_info, key=key)

    # Default path: broadcast views (same semantics as torch.broadcast_to).
    view_bundle = setup(batch_shape)
    # Dense fallback path: fused Pallas materialization.
    dense_bundle = setup(batch_shape, materialize=True)
    jax.block_until_ready(view_bundle["tensors"])
    jax.block_until_ready(dense_bundle["tensors"])

    all_params = {"Memory": setup.mem_parameter}
    all_params.update(setup.weight_parameters)
    for name, param in all_params.items():
        ref = jnp.broadcast_to(param, batch_shape + param.shape)
        assert view_bundle["tensors"][name].shape == ref.shape
        assert dense_bundle["tensors"][name].shape == ref.shape
        assert jnp.array_equal(view_bundle["tensors"][name], ref)
        assert jnp.array_equal(dense_bundle["tensors"][name], ref)
    assert view_bundle["num_batch_dim"] == len(batch_shape)
    assert dense_bundle["num_batch_dim"] == len(batch_shape)

    # Larger flattened batch: exercises the multi-step grid, the divisor-based
    # batch-block selection and the ~8 MiB per-step tiles.
    big_B = 4096
    params = [setup.mem_parameter] + list(setup.weight_parameters.values())
    big_flat = broadcast_params_to_batch(params, big_B)
    jax.block_until_ready(big_flat)
    for param, flat in zip(params, big_flat):
        ref = jnp.broadcast_to(param.reshape(1, -1), (big_B, param.size))
        assert flat.shape == ref.shape
        assert jnp.array_equal(flat, ref)

    print("KERNEL_OK")
</pallas_src>

<mosaic_0001>
module attributes {stable_mosaic.version = 11 : i64} {
  func.func @kernel(%arg0: i32, %arg1: memref<1x512xf32, #tpu.memory_space<vmem>>, %arg2: memref<1x128xf32, #tpu.memory_space<vmem>>, %arg3: memref<6x512xf32, #tpu.memory_space<vmem>>, %arg4: memref<6x128xf32, #tpu.memory_space<vmem>>) attributes {dimension_semantics = [#tpu.dimension_semantics<core_parallel>], iteration_bounds = array<i64: 1>, scalar_prefetch = 0 : i64, scratch_operands = 0 : i64, tpu.core_type = #tpu.core_type<tc>, window_params = [{pipeline_mode = #tpu.pipeline_mode<synchronous>, transform_indices = @transform_0, window_bounds = array<i64: 1, 512>}, {pipeline_mode = #tpu.pipeline_mode<synchronous>, transform_indices = @transform_1, window_bounds = array<i64: 1, 128>}, {transform_indices = @transform_2, window_bounds = array<i64: 6, 512>}, {transform_indices = @transform_3, window_bounds = array<i64: 6, 128>}]} {
    %c0 = arith.constant 0 : index
    %c0_0 = arith.constant 0 : index
    %0 = vector.load %arg1[%c0, %c0_0] : memref<1x512xf32, #tpu.memory_space<vmem>>, vector<1x512xf32>
    %1 = vector.shape_cast %0 : vector<1x512xf32> to vector<1x512xf32>
    %2 = vector.broadcast %1 : vector<1x512xf32> to vector<6x512xf32>
    %c0_1 = arith.constant 0 : index
    %c0_2 = arith.constant 0 : index
    %3 = vector.load %arg3[%c0_1, %c0_2] : memref<6x512xf32, #tpu.memory_space<vmem>>, vector<6x512xf32>
    tpu.vector_store %arg3[%c0_1, %c0_2], %2 {strides = array<i32>} : memref<6x512xf32, #tpu.memory_space<vmem>>, vector<6x512xf32>,
    %c0_3 = arith.constant 0 : index
    %c0_4 = arith.constant 0 : index
    %4 = vector.load %arg2[%c0_3, %c0_4] : memref<1x128xf32, #tpu.memory_space<vmem>>, vector<1x128xf32>
    %5 = vector.shape_cast %4 : vector<1x128xf32> to vector<1x128xf32>
    %6 = vector.broadcast %5 : vector<1x128xf32> to vector<6x128xf32>
    %c0_5 = arith.constant 0 : index
    %c0_6 = arith.constant 0 : index
    %7 = vector.load %arg4[%c0_5, %c0_6] : memref<6x128xf32, #tpu.memory_space<vmem>>, vector<6x128xf32>
    tpu.vector_store %arg4[%c0_5, %c0_6], %6 {strides = array<i32>} : memref<6x128xf32, #tpu.memory_space<vmem>>, vector<6x128xf32>,
    return
  }
  func.func @transform_0(%arg0: i32) -> (i32, i32) {
    %c0_i32 = arith.constant 0 : i32
    %c0_i32_0 = arith.constant 0 : i32
    %c0_i32_1 = arith.constant 0 : i32
    return %c0_i32, %c0_i32_0 : i32, i32
  }
  func.func @transform_1(%arg0: i32) -> (i32, i32) {
    %c0_i32 = arith.constant 0 : i32
    %c0_i32_0 = arith.constant 0 : i32
    %c0_i32_1 = arith.constant 0 : i32
    return %c0_i32, %c0_i32_0 : i32, i32
  }
  func.func @transform_2(%arg0: i32) -> (i32, i32) {
    %c0_i32 = arith.constant 0 : i32
    %c0_i32_0 = arith.constant 0 : i32
    return %arg0, %c0_i32 : i32, i32
  }
  func.func @transform_3(%arg0: i32) -> (i32, i32) {
    %c0_i32 = arith.constant 0 : i32
    %c0_i32_0 = arith.constant 0 : i32
    return %arg0, %c0_i32 : i32, i32
  }
}

module attributes {stable_mosaic.version = 11 : i64} {
  func.func @kernel(%arg0: i32, %arg1: memref<1x512xf32, #tpu.memory_space<vmem>>, %arg2: memref<1x128xf32, #tpu.memory_space<vmem>>, %arg3: memref<6x512xf32, #tpu.memory_space<vmem>>, %arg4: memref<6x128xf32, #tpu.memory_space<vmem>>) attributes {dimension_semantics = [#tpu.dimension_semantics<parallel>], iteration_bounds = array<i64: 1>, scalar_prefetch = 0 : i64, scratch_operands = 0 : i64, tpu.core_type = #tpu.core_type<tc>, window_params = [{pipeline_mode = #tpu.pipeline_mode<synchronous>, transform_indices = @transform_0, window_bounds = array<i64: 1, 512>}, {pipeline_mode = #tpu.pipeline_mode<synchronous>, transform_indices = @transform_1, window_bounds = array<i64: 1, 128>}, {transform_indices = @transform_2, window_bounds = array<i64: 6, 512>}, {transform_indices = @transform_3, window_bounds = array<i64: 6, 128>}]} {
    %c0 = arith.constant 0 : index
    %c0_0 = arith.constant 0 : index
    %0 = vector.load %arg1[%c0, %c0_0] : memref<1x512xf32, #tpu.memory_space<vmem>>, vector<1x512xf32>
    %1 = vector.shape_cast %0 : vector<1x512xf32> to vector<1x512xf32>
    %2 = vector.broadcast %1 : vector<1x512xf32> to vector<6x512xf32>
    %c0_1 = arith.constant 0 : index
    %c0_2 = arith.constant 0 : index
    %3 = vector.load %arg3[%c0_1, %c0_2] : memref<6x512xf32, #tpu.memory_space<vmem>>, vector<6x512xf32>
    tpu.vector_store %arg3[%c0_1, %c0_2], %2 {strides = array<i32>} : memref<6x512xf32, #tpu.memory_space<vmem>>, vector<6x512xf32>,
    %c0_3 = arith.constant 0 : index
    %c0_4 = arith.constant 0 : index
    %4 = vector.load %arg2[%c0_3, %c0_4] : memref<1x128xf32, #tpu.memory_space<vmem>>, vector<1x128xf32>
    %5 = vector.shape_cast %4 : vector<1x128xf32> to vector<1x128xf32>
    %6 = vector.broadcast %5 : vector<1x128xf32> to vector<6x128xf32>
    %c0_5 = arith.constant 0 : index
    %c0_6 = arith.constant 0 : index
    %7 = vector.load %arg4[%c0_5, %c0_6] : memref<6x128xf32, #tpu.memory_space<vmem>>, vector<6x128xf32>
    tpu.vector_store %arg4[%c0_5, %c0_6], %6 {strides = array<i32>} : memref<6x128xf32, #tpu.memory_space<vmem>>, vector<6x128xf32>,
    return
  }
  func.func @transform_0(%arg0: i32) -> (i32, i32) {
    %c0_i32 = arith.constant 0 : i32
    %c0_i32_0 = arith.constant 0 : i32
    %c0_i32_1 = arith.constant 0 : i32
    return %c0_i32, %c0_i32_0 : i32, i32
  }
  func.func @transform_1(%arg0: i32) -> (i32, i32) {
    %c0_i32 = arith.constant 0 : i32
    %c0_i32_0 = arith.constant 0 : i32
    %c0_i32_1 = arith.constant 0 : i32
    return %c0_i32, %c0_i32_0 : i32, i32
  }
  func.func @transform_2(%arg0: i32) -> (i32, i32) {
    %c0_i32 = arith.constant 0 : i32
    %c0_i32_0 = arith.constant 0 : i32
    return %arg0, %c0_i32 : i32, i32
  }
  func.func @transform_3(%arg0: i32) -> (i32, i32) {
    %c0_i32 = arith.constant 0 : i32
    %c0_i32_0 = arith.constant 0 : i32
    return %arg0, %c0_i32 : i32, i32
  }
}

</mosaic_0001>

<bundles_post_ra>
// kernel: tpu_custom_call.1
= control target key start
LH: loop header
LB: loop body
LE: loop exit
PB: predicated region body
PF: predicated region fallthrough
CT: control target
= control target key end

     0   :  { %s206_s12 = sld [smem:[#allocation0]]   ;;  %s257_s0 = inlined_call_operand.hbm [shape: f32[1,512], index: 0, kind: input, shape index: {}]   ;;  %s258_s1 = inlined_call_operand.vmem [shape: f32[1,128], index: 1, kind: input, shape index: {}]   ;;  %s259_s2 = inlined_call_operand.hbm [shape: f32[6,512], index: 2, kind: output, shape index: {0}]   ;;  %s260_s3 = inlined_call_operand.hbm [shape: f32[6,128], index: 3, kind: output, shape index: {1}]  }
   0x1   :  { %9 = vsyncpa [#allocation3], 0 }
   0x2   :  { %10 = vsyncpa [#allocation4], 0 }
   0x3   :  { %11 = vsyncpa [#allocation7], 0  ;;  %s183_s13 = smov [#allocation2]   ;;  %s107_s17 = scalar_lea.hbm %s257_s0, 64 }
   0x4   :  { %s18_s14 = sshll.u32 %s183_s13, 4  ;;  %p108_p0 = scmp.ne.s32.totalorder %s257_s0, %s107_s17  ;;  %s19_s14 = int_to_ptr.vmem [resolvable:$true] %s18_s14 }
   0x5   :  { %p111_p1 = scmp.lt.u32.totalorder %s107_s17, %s257_s0 }
   0x7   :  { %p113_p2 = pnand %p111_p1, %p108_p0 }
   0x9   :  { %116 = shalt.err (!%p113_p2)
}
   0xa   :  { %s117_s22 = scalar_lea.vmem %s19_s14, 64  ;;  %p122_p4 = scmp.lt.s32.totalorder %s19_s14, %s19_s14 }
   0xb   :  { %p118_p3 = scmp.ne.s32.totalorder %s19_s14, %s117_s22  ;;  %p123_p5 = scmp.lt.s32.totalorder %s117_s22, %s117_s22 }
   0xd   :  { %p124_p6 = por %p123_p5, %p122_p4 }
   0xf   :  { %p125_p7 = pnand %p124_p6, %p118_p3 }
  0x11   :  { %128 = shalt.err (!%p125_p7)
}
  0x12   :  { %21 = dma.hbm_to_vmem [thread:$0]  %s257_s0, 64, %s19_s14, [#allocation3]  }
  0x13   :  { %177 = dma.done.wait [#allocation3], 64  }
  0x14   :  { %178 = vsyncadd [#allocation3], 4294967232  ;;  %v29_v0 = vlaneseq  ;;  %s102_s25 = sshll.u32 %s206_s12, 7  ;;  %s184_s26 = smov [#allocation6]   ;;  %v27_v6 = vld [vmem:[#allocation2] sm:$0xf] }
  0x15   :  { %s82_s27 = sshll.u32 %s184_s26, 4  ;;  %s103_s28 = sshll.u32 %s206_s12, 9  ;;  %v99_v7 = vld [vmem:[%s258_s1] ss:$0 sm:$0xff]  ;;  %s83_s27 = int_to_ptr.vmem [resolvable:$true] %s82_s27 }
  0x16   :  { %v30_v1 = vshrl.u32 %v29_v0, 7  ;;  %s185_s29 = smov [#allocation5]   ;;  %s80_s0 = scalar_lea.hbm %s260_s3, %s102_s25  ;;  %60 = vst [vmem:[#allocation6] sm:$0x3f] %v99_v7 }
  0x17   :  { %s70_s30 = sshll.u32 %s185_s29, 4  ;;  %s231_s10 = scalar_lea.hbm %s259_s2, %s103_s28  ;;  %s233_s30 = int_to_ptr.vmem [resolvable:$true] %s70_s30 }
  0x18   :  { %v31_v2 = vsub.s32 0, %v30_v1  ;;  %v35_v3 = vsub.s32 1, %v30_v1  ;;  %v39_v4 = vsub.s32 2, %v30_v1  ;;  %v43_v5 = vsub.s32 3, %v30_v1  ;;  %s129_s11 = scalar_lea.vmem %s83_s27, 128  ;;  %p134_p9 = scmp.lt.s32.totalorder %s83_s27, %s83_s27 }
  0x19   :  { %p130_p8 = scmp.ne.s32.totalorder %s83_s27, %s129_s11  ;;  %p135_p10 = scmp.lt.s32.totalorder %s129_s11, %s129_s11 }
  0x1a   :  { %v32_v8 = vrot.slane %v27_v6, %v31_v2  ;;  %v36_v9 = vrot.slane %v27_v6, %v35_v3  ;;  %v40_v10 = vrot.slane %v27_v6, %v39_v4  ;;  %v44_v11 = vrot.slane %v27_v6, %v43_v5 }
  0x1b   :  { %p136_p11 = por %p135_p10, %p134_p9 }
  0x1d   :  { %p137_p12 = pnand %p136_p11, %p130_p8 }
  0x1f   :  { %140 = shalt.err (!%p137_p12)
}
  0x20   :  { %s141_s1 = scalar_lea.hbm %s80_s0, 128  ;;  %s143_s14 = scalar_lea.hbm %s260_s3, 128 }
  0x21   :  { %p142_p13 = scmp.ne.s32.totalorder %s80_s0, %s141_s1  ;;  %p144_p0 = scmp.lt.u32.totalorder %s80_s0, %s260_s3 }
  0x22   :  { %p145_p1 = scmp.lt.u32.totalorder %s143_s14, %s141_s1  ;;  %p147_p3 = scmp.lt.u32.totalorder %s141_s1, %s80_s0 }
  0x24   :  { %p146_p2 = por %p145_p1, %p144_p0 }
  0x26   :  { %p148_p4 = por %p147_p3, %p146_p2 }
  0x28   :  { %p149_p5 = pnand %p148_p4, %p142_p13 }
  0x2a   :  { %152 = shalt.err (!%p149_p5)
}
  0x2b   :  { %85 = dma.vmem_to_hbm [thread:$0]  %s83_s27, 128, %s80_s0, [#allocation7]   ;;  %49 = vst [vmem:[#allocation5] sm:$0x3f] %v32_v8  ;;  %50 = vst [vmem:[#allocation5 + $0x8] sm:$0x3f] %v36_v9 }
  0x2c   :  { %51 = vst [vmem:[#allocation5 + $0x10] sm:$0x3f] %v40_v10  ;;  %52 = vst [vmem:[#allocation5 + $0x18] sm:$0x3f] %v44_v11  ;;  %s153_s17 = scalar_lea.vmem %s233_s30, 512  ;;  %p158_p7 = scmp.lt.s32.totalorder %s233_s30, %s233_s30 }
  0x2d   :  { %p154_p6 = scmp.ne.s32.totalorder %s233_s30, %s153_s17  ;;  %p159_p8 = scmp.lt.s32.totalorder %s153_s17, %s153_s17 }
  0x2f   :  { %p160_p9 = por %p159_p8, %p158_p7 }
  0x31   :  { %p161_p10 = pnand %p160_p9, %p154_p6 }
  0x33   :  { %164 = shalt.err (!%p161_p10)
}
  0x34   :  { %s165_s3 = scalar_lea.hbm %s231_s10, 512  ;;  %s167_s20 = scalar_lea.hbm %s259_s2, 512 }
  0x35   :  { %p166_p11 = scmp.ne.s32.totalorder %s231_s10, %s165_s3  ;;  %p168_p12 = scmp.lt.u32.totalorder %s231_s10, %s259_s2 }
  0x36   :  { %p169_p13 = scmp.lt.u32.totalorder %s167_s20, %s165_s3  ;;  %p171_p1 = scmp.lt.u32.totalorder %s165_s3, %s231_s10 }
  0x38   :  { %p170_p0 = por %p169_p13, %p168_p12 }
  0x3a   :  { %p172_p2 = por %p171_p1, %p170_p0 }
  0x3c   :  { %p173_p3 = pnand %p172_p2, %p166_p11 }
  0x3e   :  { %176 = shalt.err (!%p173_p3)
}
  0x3f   :  { %73 = dma.vmem_to_hbm [thread:$0]  %s233_s30, 512, %s231_s10, [#allocation4]  }
  0x40   :  { %179 = dma.done.wait [#allocation4], 512  }
  0x41   :  { %180 = vsyncadd [#allocation4], 4294966784 }
  0x42   :  { %181 = dma.done.wait [#allocation7], 128  }
  0x43   :  { %182 = vsyncadd [#allocation7], 4294967168 }
  0x44   :  { %92 = vsyncpa [#allocation3], 1 }
  0x45   :  { %93 = vsyncpa [#allocation4], 1 }
  0x46   :  { %94 = vsyncpa [#allocation7], 1 }

// kernel: tpu_custom_call.1
= control target key start
LH: loop header
LB: loop body
LE: loop exit
PB: predicated region body
PF: predicated region fallthrough
CT: control target
= control target key end

     0   :  { %9 = vsyncpa [#allocation3], 0  ;;  %s235_s0 = inlined_call_operand.hbm [shape: f32[1,512], index: 0, kind: input, shape index: {}]   ;;  %s236_s1 = inlined_call_operand.vmem [shape: f32[1,128], index: 1, kind: input, shape index: {}]   ;;  %s237_s2 = inlined_call_operand.hbm [shape: f32[6,512], index: 2, kind: output, shape index: {0}]   ;;  %s238_s3 = inlined_call_operand.hbm [shape: f32[6,128], index: 3, kind: output, shape index: {1}]  }
   0x1   :  { %10 = vsyncpa [#allocation4], 0 }
   0x2   :  { %11 = vsyncpa [#allocation7], 0  ;;  %s166_s12 = smov [#allocation2]   ;;  %s94_s16 = scalar_lea.hbm %s235_s0, 64 }
   0x3   :  { %s18_s13 = sshll.u32 %s166_s12, 4  ;;  %p95_p0 = scmp.ne.s32.totalorder %s235_s0, %s94_s16  ;;  %s19_s13 = int_to_ptr.vmem [resolvable:$true] %s18_s13 }
   0x4   :  { %p98_p1 = scmp.lt.u32.totalorder %s94_s16, %s235_s0 }
   0x6   :  { %p100_p2 = pnand %p98_p1, %p95_p0 }
   0x8   :  { %103 = shalt.err (!%p100_p2)
}
   0x9   :  { %s104_s21 = scalar_lea.vmem %s19_s13, 64  ;;  %p109_p4 = scmp.lt.s32.totalorder %s19_s13, %s19_s13 }
   0xa   :  { %p105_p3 = scmp.ne.s32.totalorder %s19_s13, %s104_s21  ;;  %p110_p5 = scmp.lt.s32.totalorder %s104_s21, %s104_s21 }
   0xc   :  { %p111_p6 = por %p110_p5, %p109_p4 }
   0xe   :  { %p112_p7 = pnand %p111_p6, %p105_p3 }
  0x10   :  { %115 = shalt.err (!%p112_p7)
}
  0x11   :  { %21 = dma.hbm_to_vmem [thread:$0]  %s235_s0, 64, %s19_s13, [#allocation3]  }
  0x12   :  { %160 = dma.done.wait [#allocation3], 64  }
  0x13   :  { %161 = vsyncadd [#allocation3], 4294967232  ;;  %v29_v0 = vlaneseq  ;;  %s167_s24 = smov [#allocation6]   ;;  %s168_s26 = smov [#allocation5]   ;;  %v27_v6 = vld [vmem:[#allocation2] sm:$0xf] }
  0x14   :  { %s77_s25 = sshll.u32 %s167_s24, 4  ;;  %s67_s27 = sshll.u32 %s168_s26, 4  ;;  %v90_v7 = vld [vmem:[%s236_s1] ss:$0 sm:$0xff]  ;;  %s78_s25 = int_to_ptr.vmem [resolvable:$true] %s77_s25  ;;  %s204_s27 = int_to_ptr.vmem [resolvable:$true] %s67_s27 }
  0x15   :  { %v30_v1 = vshrl.u32 %v29_v0, 7  ;;  %60 = vst [vmem:[#allocation6] sm:$0x3f] %v90_v7  ;;  %s116_s0 = scalar_lea.vmem %s78_s25, 128  ;;  %p121_p9 = scmp.lt.s32.totalorder %s78_s25, %s78_s25 }
  0x16   :  { %p117_p8 = scmp.ne.s32.totalorder %s78_s25, %s116_s0  ;;  %p122_p10 = scmp.lt.s32.totalorder %s116_s0, %s116_s0 }
  0x17   :  { %v31_v2 = vsub.s32 0, %v30_v1  ;;  %v35_v3 = vsub.s32 1, %v30_v1  ;;  %v39_v4 = vsub.s32 2, %v30_v1  ;;  %v43_v5 = vsub.s32 3, %v30_v1 }
  0x18   :  { %p123_p11 = por %p122_p10, %p121_p9 }
  0x19   :  { %v32_v8 = vrot.slane %v27_v6, %v31_v2  ;;  %v36_v9 = vrot.slane %v27_v6, %v35_v3  ;;  %v40_v10 = vrot.slane %v27_v6, %v39_v4  ;;  %v44_v11 = vrot.slane %v27_v6, %v43_v5 }
  0x1a   :  { %p124_p12 = pnand %p123_p11, %p117_p8 }
  0x1c   :  { %127 = shalt.err (!%p124_p12)
}
  0x1d   :  { %s128_s5 = scalar_lea.hbm %s238_s3, 128 }
  0x1e   :  { %p129_p13 = scmp.ne.s32.totalorder %s238_s3, %s128_s5  ;;  %p132_p0 = scmp.lt.u32.totalorder %s128_s5, %s238_s3 }
  0x20   :  { %p134_p1 = pnand %p132_p0, %p129_p13 }
  0x22   :  { %137 = shalt.err (!%p134_p1)
}
  0x23   :  { %80 = dma.vmem_to_hbm [thread:$0]  %s78_s25, 128, %s238_s3, [#allocation7]   ;;  %49 = vst [vmem:[#allocation5] sm:$0x3f] %v32_v8  ;;  %50 = vst [vmem:[#allocation5 + $0x8] sm:$0x3f] %v36_v9 }
  0x24   :  { %51 = vst [vmem:[#allocation5 + $0x10] sm:$0x3f] %v40_v10  ;;  %52 = vst [vmem:[#allocation5 + $0x18] sm:$0x3f] %v44_v11  ;;  %s138_s11 = scalar_lea.vmem %s204_s27, 512  ;;  %p143_p3 = scmp.lt.s32.totalorder %s204_s27, %s204_s27 }
  0x25   :  { %p139_p2 = scmp.ne.s32.totalorder %s204_s27, %s138_s11  ;;  %p144_p4 = scmp.lt.s32.totalorder %s138_s11, %s138_s11 }
  0x27   :  { %p145_p5 = por %p144_p4, %p143_p3 }
  0x29   :  { %p146_p6 = pnand %p145_p5, %p139_p2 }
  0x2b   :  { %149 = shalt.err (!%p146_p6)
}
  0x2c   :  { %s150_s14 = scalar_lea.hbm %s237_s2, 512 }
  0x2d   :  { %p151_p7 = scmp.ne.s32.totalorder %s237_s2, %s150_s14  ;;  %p154_p8 = scmp.lt.u32.totalorder %s150_s14, %s237_s2 }
  0x2f   :  { %p156_p9 = pnand %p154_p8, %p151_p7 }
  0x31   :  { %159 = shalt.err (!%p156_p9)
}
  0x32   :  { %70 = dma.vmem_to_hbm [thread:$0]  %s204_s27, 512, %s237_s2, [#allocation4]  }
  0x33   :  { %162 = dma.done.wait [#allocation4], 512  }
  0x34   :  { %163 = vsyncadd [#allocation4], 4294966784 }
  0x35   :  { %164 = dma.done.wait [#allocation7], 128  }
  0x36   :  { %165 = vsyncadd [#allocation7], 4294967168 }
  0x37   :  { %87 = vsyncpa [#allocation3], 1 }
  0x38   :  { %88 = vsyncpa [#allocation4], 1 }
  0x39   :  { %89 = vsyncpa [#allocation7], 1 }

</bundles_post_ra>
